<compile_context>
chip_gen: v6e
topology: v6e:2x2x1
jax: 0.10.0
libtpu: 0.0.40
codegen_flags: <defaults>
</compile_context>

<pallas_src>
import functools

import jax
import jax.numpy as jnp
from jax.experimental import pallas as pl
from jax.experimental.pallas import tpu as pltpu


def _round_up(n, m):
    return ((n + m - 1) // m) * m


def _vmem_limit_bytes():
    # Leave headroom for Mosaic internal scratch; v7x only has 64 MiB per TC.
    try:
        cap = pltpu.get_tpu_info().vmem_capacity_bytes
        return max(32 * 1024 * 1024, min(int(cap * 3 // 4), 96 * 1024 * 1024))
    except Exception:
        return 48 * 1024 * 1024


def _pick_dff_tile(d_model, d_ff, weight_budget_bytes):
    """Largest d_ff chunk (divisor of d_ff, lane-aligned) whose bf16 w1/w2
    slices (double-buffered) fit the resident-weight budget."""
    bytes_per_col = 8 * d_model            # (w1 col + w2 row) bf16, x2 buffers
    if d_ff * bytes_per_col <= weight_budget_bytes or d_ff <= 128:
        return d_ff
    tk = (weight_budget_bytes // bytes_per_col) // 128 * 128
    tk = max(128, min(tk, d_ff))
    while tk > 128 and d_ff % tk != 0:
        tk -= 128
    # A non-dividing chunk would mix garbage into the accumulation; fall back.
    return tk if d_ff % tk == 0 else d_ff


# ---------------------------------------------------------------------------
# Fused FFN sublayer + Encoder.norm kernel (MXU path, LN epilogue)
# ---------------------------------------------------------------------------
def _ffn_ln_kernel(x_ref, w1_ref, b1_ref, w2_ref, b2_ref, g_ref, bn_ref,
                   o_ref, acc_ref, *, eps, nfeat):
    k = pl.program_id(1)

    @pl.when(k == 0)
    def _():
        acc_ref[...] = jnp.zeros_like(acc_ref)

    x = x_ref[...].astype(jnp.bfloat16)            # cast in-kernel (no HBM pass)
    h = jnp.dot(x, w1_ref[...], preferred_element_type=jnp.float32)
    h = jnp.maximum(h + b1_ref[...], 0.0)          # bias + ReLU in f32 (VPU)
    # dropout == identity (inference mode)
    acc_ref[...] += jnp.dot(h.astype(jnp.bfloat16), w2_ref[...],
                            preferred_element_type=jnp.float32)

    @pl.when(k == pl.num_programs(1) - 1)
    def _():
        y = acc_ref[...] + b2_ref[...]
        # Encoder.norm fused epilogue. torch.Tensor.std uses the unbiased
        # (n-1) estimator and the module adds eps to std (not under the sqrt).
        mean = jnp.mean(y, axis=-1, keepdims=True)
        d = y - mean
        var = jnp.sum(d * d, axis=-1, keepdims=True) / max(nfeat - 1, 1)
        inv = 1.0 / (jnp.sqrt(var) + eps)          # per-row (tm,1) exact recip
        o_ref[...] = (d * inv * g_ref[...] + bn_ref[...]).astype(o_ref.dtype)


def encoder_ffn_layernorm(x, w1, b1, w2, b2, gamma, beta, *, eps=1e-6, tm=256):
    """FFN sublayer + Encoder.norm fused into one kernel.

    x: (B, S, d_model). Weights pre-transposed vs PyTorch:
    w1 (d_model, d_ff), w2 (d_ff, d_model).
    """
    B, S, d_model = x.shape
    d_ff = w1.shape[1]
    N = B * S

    tm_eff = min(tm, _round_up(N, 8))
    vmem_limit = _vmem_limit_bytes()
    tk_ff = _pick_dff_tile(d_model, d_ff, weight_budget_bytes=vmem_limit // 3)

    x2d = x.reshape(N, d_model)                    # native dtype, no pad
    w1_bf = w1.astype(jnp.bfloat16)                # parameter-sized one-time cast
    w2_bf = w2.astype(jnp.bfloat16)
    b1_2d = b1.reshape(1, d_ff).astype(jnp.float32)
    b2_2d = b2.reshape(1, d_model).astype(jnp.float32)
    g_2d = gamma.reshape(1, d_model).astype(jnp.float32)
    bn_2d = beta.reshape(1, d_model).astype(jnp.float32)

    grid = (pl.cdiv(N, tm_eff), pl.cdiv(d_ff, tk_ff))

    itemsize = x2d.dtype.itemsize
    cost = pl.CostEstimate(
        flops=4 * N * d_model * d_ff,
        transcendentals=N,
        bytes_accessed=(itemsize * N * d_model          # x in
                        + 2 * 2 * d_model * d_ff        # w1 + w2 (bf16)
                        + 4 * (d_ff + 3 * d_model)      # biases / gamma / beta
                        + itemsize * N * d_model))      # out

    grid_spec = pltpu.PrefetchScalarGridSpec(
        num_scalar_prefetch=0,
        grid=grid,
        in_specs=[
            pl.BlockSpec((tm_eff, d_model), lambda i, k: (i, 0)),   # x rows
            pl.BlockSpec((d_model, tk_ff), lambda i, k: (0, k)),    # w1 chunk
            pl.BlockSpec((1, tk_ff), lambda i, k: (0, k)),          # b1 chunk
            pl.BlockSpec((tk_ff, d_model), lambda i, k: (k, 0)),    # w2 chunk
            pl.BlockSpec((1, d_model), lambda i, k: (0, 0)),        # b2
            pl.BlockSpec((1, d_model), lambda i, k: (0, 0)),        # gamma
            pl.BlockSpec((1, d_model), lambda i, k: (0, 0)),        # beta
        ],
        out_specs=pl.BlockSpec((tm_eff, d_model), lambda i, k: (i, 0)),
        scratch_shapes=[pltpu.VMEM((tm_eff, d_model), jnp.float32)],
    )

    out2d = pl.pallas_call(
        functools.partial(_ffn_ln_kernel, eps=eps, nfeat=d_model),
        out_shape=jax.ShapeDtypeStruct((N, d_model), x.dtype),
        grid_spec=grid_spec,
        compiler_params=pltpu.CompilerParams(
            dimension_semantics=("parallel", "arbitrary"),
            vmem_limit_bytes=vmem_limit),
        cost_estimate=cost,
    )(x2d, w1_bf, b1_2d, w2_bf, b2_2d, g_2d, bn_2d)

    return out2d.reshape(B, S, d_model)


# ---------------------------------------------------------------------------
# Standalone Encoder.norm (LayerNorm) kernel
# ---------------------------------------------------------------------------
def _layernorm_kernel(x_ref, g_ref, b_ref, o_ref, *, eps, nfeat):
    x = x_ref[...].astype(jnp.float32)
    mean = jnp.mean(x, axis=-1, keepdims=True)
    d = x - mean
    var = jnp.sum(d * d, axis=-1, keepdims=True) / max(nfeat - 1, 1)
    inv = 1.0 / (jnp.sqrt(var) + eps)              # per-row (tm,1) exact recip
    o_ref[...] = (d * inv * g_ref[...] + b_ref[...]).astype(o_ref.dtype)


def encoder_layer_norm(x, gamma, beta, *, eps=1e-6, tm=512):
    """Encoder.norm: LayerNorm over the last dim. x: (B, S, features)."""
    B, S, F = x.shape
    N = B * S
    tm_eff = min(tm, _round_up(N, 8))

    x2d = x.reshape(N, F)                          # native dtype, no pad
    g2d = gamma.reshape(1, F).astype(jnp.float32)
    b2d = beta.reshape(1, F).astype(jnp.float32)

    grid_spec = pltpu.PrefetchScalarGridSpec(
        num_scalar_prefetch=0,
        grid=(pl.cdiv(N, tm_eff),),
        in_specs=[
            pl.BlockSpec((tm_eff, F), lambda i: (i, 0)),
            pl.BlockSpec((1, F), lambda i: (0, 0)),
            pl.BlockSpec((1, F), lambda i: (0, 0)),
        ],
        out_specs=pl.BlockSpec((tm_eff, F), lambda i: (i, 0)),
    )
    out2d = pl.pallas_call(
        functools.partial(_layernorm_kernel, eps=eps, nfeat=F),
        out_shape=jax.ShapeDtypeStruct((N, F), x.dtype),
        grid_spec=grid_spec,
        compiler_params=pltpu.CompilerParams(
            dimension_semantics=("parallel",)),
    )(x2d, g2d, b2d)
    return out2d.reshape(B, S, F)


def init_params(key, d_model, d_ff):
    """Deterministic init mimicking nn.Linear default (uniform +-1/sqrt(fan_in))."""
    k1, k2, k3, k4 = jax.random.split(key, 4)
    bound1 = 1.0 / (d_model ** 0.5)
    bound2 = 1.0 / (d_ff ** 0.5)
    # Stored pre-transposed relative to PyTorch's (out, in) convention.
    w1 = jax.random.uniform(k1, (d_model, d_ff), jnp.float32, -bound1, bound1)
    b1 = jax.random.uniform(k2, (d_ff,), jnp.float32, -bound1, bound1)
    w2 = jax.random.uniform(k3, (d_ff, d_model), jnp.float32, -bound2, bound2)
    b2 = jax.random.uniform(k4, (d_model,), jnp.float32, -bound2, bound2)
    return w1, b1, w2, b2


if __name__ == "__main__":
    B, S, d_model, d_ff = 2, 8, 128, 256
    eps = 1e-6

    key = jax.random.PRNGKey(0)
    kx, kp, kg, kb = jax.random.split(key, 4)
    x = jax.random.normal(kx, (B, S, d_model), jnp.float32)
    w1, b1, w2, b2 = init_params(kp, d_model, d_ff)
    gamma = 1.0 + 0.1 * jax.random.normal(kg, (d_model,), jnp.float32)
    beta = 0.1 * jax.random.normal(kb, (d_model,), jnp.float32)

    # Fused FFN sublayer + Encoder.norm (single Pallas kernel).
    z = encoder_ffn_layernorm(x, w1, b1, w2, b2, gamma, beta, eps=eps)
    z = jax.block_until_ready(z)

    # --- f32 references (torch semantics: unbiased std, eps added to std) ---
    ref_y = jnp.maximum(x @ w1 + b1, 0.0) @ w2 + b2
    mean = ref_y.mean(-1, keepdims=True)
    std = jnp.std(ref_y, axis=-1, ddof=1, keepdims=True)
    ref_z = gamma * (ref_y - mean) / (std + eps) + beta

    # Standalone Encoder.norm kernel on the f32 reference activation.
    z_ln = encoder_layer_norm(ref_y, gamma, beta, eps=eps)
    z_ln = jax.block_until_ready(z_ln)

    assert z.shape == (B, S, d_model)
    assert z_ln.shape == (B, S, d_model)
    # Standalone LN runs fully in f32 -> tight tolerance.
    assert jnp.allclose(z_ln, ref_z, atol=1e-4, rtol=1e-4)
    # Fused path uses bf16 MXU operands with f32 accumulation -> looser tolerance.
    assert jnp.allclose(z, ref_z, atol=5e-2, rtol=5e-2)

    print("KERNEL_OK")
</pallas_src>

<mosaic_0001>
module attributes {stable_mosaic.version = 11 : i64} {
  func.func @_ffn_ln_kernel(%arg0: i32, %arg1: i32, %arg2: memref<16x128xf32, #tpu.memory_space<vmem>>, %arg3: memref<128x256xbf16, #tpu.memory_space<vmem>>, %arg4: memref<1x256xf32, #tpu.memory_space<vmem>>, %arg5: memref<256x128xbf16, #tpu.memory_space<vmem>>, %arg6: memref<1x128xf32, #tpu.memory_space<vmem>>, %arg7: memref<1x128xf32, #tpu.memory_space<vmem>>, %arg8: memref<1x128xf32, #tpu.memory_space<vmem>>, %arg9: memref<16x128xf32, #tpu.memory_space<vmem>>, %arg10: memref<16x128xf32, #tpu.memory_space<vmem>>) attributes {dimension_semantics = [#tpu.dimension_semantics<parallel>, #tpu.dimension_semantics<arbitrary>], iteration_bounds = array<i64: 1, 1>, scalar_prefetch = 0 : i64, scratch_operands = 1 : i64, tpu.core_type = #tpu.core_type<tc>, window_params = [{transform_indices = @transform_0, window_bounds = array<i64: 16, 128>}, {transform_indices = @transform_1, window_bounds = array<i64: 128, 256>}, {transform_indices = @transform_2, window_bounds = array<i64: 1, 256>}, {transform_indices = @transform_3, window_bounds = array<i64: 256, 128>}, {pipeline_mode = #tpu.pipeline_mode<synchronous>, transform_indices = @transform_4, window_bounds = array<i64: 1, 128>}, {pipeline_mode = #tpu.pipeline_mode<synchronous>, transform_indices = @transform_5, window_bounds = array<i64: 1, 128>}, {pipeline_mode = #tpu.pipeline_mode<synchronous>, transform_indices = @transform_6, window_bounds = array<i64: 1, 128>}, {transform_indices = @transform_7, window_bounds = array<i64: 16, 128>}]} {
    %c0_i32 = arith.constant 0 : i32
    %0 = arith.cmpi eq, %arg1, %c0_i32 : i32
    %1 = arith.extui %0 : i1 to i32
    %c0_i32_0 = arith.constant 0 : i32
    %2 = arith.cmpi ne, %1, %c0_i32_0 : i32
    scf.if %2 {
      %cst_16 = arith.constant 0.000000e+00 : f32
      %21 = vector.broadcast %cst_16 : f32 to vector<16x128xf32>
      %c0_17 = arith.constant 0 : index
      %c0_18 = arith.constant 0 : index
      %22 = vector.load %arg10[%c0_17, %c0_18] : memref<16x128xf32, #tpu.memory_space<vmem>>, vector<16x128xf32>
      tpu.vector_store %arg10[%c0_17, %c0_18], %21 {strides = array<i32>} : memref<16x128xf32, #tpu.memory_space<vmem>>, vector<16x128xf32>,
    } else {
    }
    %c0 = arith.constant 0 : index
    %c0_1 = arith.constant 0 : index
    %3 = vector.load %arg2[%c0, %c0_1] : memref<16x128xf32, #tpu.memory_space<vmem>>, vector<16x128xf32>
    %4 = arith.truncf %3 : vector<16x128xf32> to vector<16x128xbf16>
    %c0_2 = arith.constant 0 : index
    %c0_3 = arith.constant 0 : index
    %5 = vector.load %arg3[%c0_2, %c0_3] : memref<128x256xbf16, #tpu.memory_space<vmem>>, vector<128x256xbf16>
    %cst = arith.constant dense<0.000000e+00> : vector<16x256xf32>
    %6 = tpu.matmul %4, %5, %cst {dimension_numbers = #tpu.dot_dimension_numbers<[1], [0], [0], [1], [0, 0, 1, 1], [], []>} : vector<16x128xbf16>, vector<128x256xbf16>, vector<16x256xf32> -> vector<16x256xf32>
    %c0_4 = arith.constant 0 : index
    %c0_5 = arith.constant 0 : index
    %7 = vector.load %arg4[%c0_4, %c0_5] : memref<1x256xf32, #tpu.memory_space<vmem>>, vector<1x256xf32>
    %8 = vector.broadcast %7 : vector<1x256xf32> to vector<16x256xf32>
    %9 = arith.addf %6, %8 : vector<16x256xf32>
    %cst_6 = arith.constant 0.000000e+00 : f32
    %10 = vector.broadcast %cst_6 : f32 to vector<16x256xf32>
    %11 = arith.maximumf %9, %10 : vector<16x256xf32>
    %c0_7 = arith.constant 0 : index
    %c0_8 = arith.constant 0 : index
    %12 = vector.load %arg10[%c0_7, %c0_8] : memref<16x128xf32, #tpu.memory_space<vmem>>, vector<16x128xf32>
    %13 = arith.truncf %11 : vector<16x256xf32> to vector<16x256xbf16>
    %c0_9 = arith.constant 0 : index
    %c0_10 = arith.constant 0 : index
    %14 = vector.load %arg5[%c0_9, %c0_10] : memref<256x128xbf16, #tpu.memory_space<vmem>>, vector<256x128xbf16>
    %cst_11 = arith.constant dense<0.000000e+00> : vector<16x128xf32>
    %15 = tpu.matmul %13, %14, %cst_11 {dimension_numbers = #tpu.dot_dimension_numbers<[1], [0], [0], [1], [0, 0, 1, 1], [], []>} : vector<16x256xbf16>, vector<256x128xbf16>, vector<16x128xf32> -> vector<16x128xf32>
    %16 = arith.addf %12, %15 : vector<16x128xf32>
    %c0_12 = arith.constant 0 : index
    %c0_13 = arith.constant 0 : index
    %17 = vector.load %arg10[%c0_12, %c0_13] : memref<16x128xf32, #tpu.memory_space<vmem>>, vector<16x128xf32>
    tpu.vector_store %arg10[%c0_12, %c0_13], %16 {strides = array<i32>} : memref<16x128xf32, #tpu.memory_space<vmem>>, vector<16x128xf32>,
    %c0_i32_14 = arith.constant 0 : i32
    %18 = arith.cmpi eq, %arg1, %c0_i32_14 : i32
    %19 = arith.extui %18 : i1 to i32
    %c0_i32_15 = arith.constant 0 : i32
    %20 = arith.cmpi ne, %19, %c0_i32_15 : i32
    scf.if %20 {
      %c0_16 = arith.constant 0 : index
      %c0_17 = arith.constant 0 : index
      %21 = vector.load %arg10[%c0_16, %c0_17] : memref<16x128xf32, #tpu.memory_space<vmem>>, vector<16x128xf32>
      %c0_18 = arith.constant 0 : index
      %c0_19 = arith.constant 0 : index
      %22 = vector.load %arg6[%c0_18, %c0_19] : memref<1x128xf32, #tpu.memory_space<vmem>>, vector<1x128xf32>
      %23 = vector.broadcast %22 : vector<1x128xf32> to vector<16x128xf32>
      %24 = arith.addf %21, %23 : vector<16x128xf32>
      %cst_20 = arith.constant dense<0.000000e+00> : vector<16xf32>
      %25 = vector.multi_reduction <add>, %24, %cst_20 [1] : vector<16x128xf32> to vector<16xf32>
      %26 = vector.shape_cast %25 : vector<16xf32> to vector<16x1xf32>
      %cst_21 = arith.constant 1.280000e+02 : f32
      %27 = vector.broadcast %cst_21 : f32 to vector<16x1xf32>
      %28 = arith.divf %26, %27 : vector<16x1xf32>
      %29 = vector.broadcast %28 : vector<16x1xf32> to vector<16x128xf32>
      %30 = arith.subf %24, %29 : vector<16x128xf32>
      %31 = arith.mulf %30, %30 : vector<16x128xf32>
      %cst_22 = arith.constant dense<0.000000e+00> : vector<16xf32>
      %32 = vector.multi_reduction <add>, %31, %cst_22 [1] : vector<16x128xf32> to vector<16xf32>
      %33 = vector.shape_cast %32 : vector<16xf32> to vector<16x1xf32>
      %cst_23 = arith.constant 1.270000e+02 : f32
      %34 = vector.broadcast %cst_23 : f32 to vector<16x1xf32>
      %35 = arith.divf %33, %34 : vector<16x1xf32>
      %36 = math.sqrt %35 : vector<16x1xf32>
      %cst_24 = arith.constant 9.99999997E-7 : f32
      %37 = vector.broadcast %cst_24 : f32 to vector<16x1xf32>
      %38 = arith.addf %36, %37 : vector<16x1xf32>
      %cst_25 = arith.constant 1.000000e+00 : f32
      %39 = vector.broadcast %cst_25 : f32 to vector<16x1xf32>
      %40 = arith.divf %39, %38 : vector<16x1xf32>
      %41 = vector.broadcast %40 : vector<16x1xf32> to vector<16x128xf32>
      %42 = arith.mulf %30, %41 : vector<16x128xf32>
      %c0_26 = arith.constant 0 : index
      %c0_27 = arith.constant 0 : index
      %43 = vector.load %arg7[%c0_26, %c0_27] : memref<1x128xf32, #tpu.memory_space<vmem>>, vector<1x128xf32>
      %44 = vector.broadcast %43 : vector<1x128xf32> to vector<16x128xf32>
      %45 = arith.mulf %42, %44 : vector<16x128xf32>
      %c0_28 = arith.constant 0 : index
      %c0_29 = arith.constant 0 : index
      %46 = vector.load %arg8[%c0_28, %c0_29] : memref<1x128xf32, #tpu.memory_space<vmem>>, vector<1x128xf32>
      %47 = vector.broadcast %46 : vector<1x128xf32> to vector<16x128xf32>
      %48 = arith.addf %45, %47 : vector<16x128xf32>
      %c0_30 = arith.constant 0 : index
      %c0_31 = arith.constant 0 : index
      %49 = vector.load %arg9[%c0_30, %c0_31] : memref<16x128xf32, #tpu.memory_space<vmem>>, vector<16x128xf32>
      tpu.vector_store %arg9[%c0_30, %c0_31], %48 {strides = array<i32>} : memref<16x128xf32, #tpu.memory_space<vmem>>, vector<16x128xf32>,
    } else {
    }
    return
  }
  func.func @transform_0(%arg0: i32, %arg1: i32) -> (i32, i32) {
    %c0_i32 = arith.constant 0 : i32
    %c0_i32_0 = arith.constant 0 : i32
    return %arg0, %c0_i32 : i32, i32
  }
  func.func @transform_1(%arg0: i32, %arg1: i32) -> (i32, i32) {
    %c0_i32 = arith.constant 0 : i32
    %c0_i32_0 = arith.constant 0 : i32
    return %c0_i32, %arg1 : i32, i32
  }
  func.func @transform_2(%arg0: i32, %arg1: i32) -> (i32, i32) {
    %c0_i32 = arith.constant 0 : i32
    %c0_i32_0 = arith.constant 0 : i32
    return %c0_i32, %arg1 : i32, i32
  }
  func.func @transform_3(%arg0: i32, %arg1: i32) -> (i32, i32) {
    %c0_i32 = arith.constant 0 : i32
    %c0_i32_0 = arith.constant 0 : i32
    return %arg1, %c0_i32 : i32, i32
  }
  func.func @transform_4(%arg0: i32, %arg1: i32) -> (i32, i32) {
    %c0_i32 = arith.constant 0 : i32
    %c0_i32_0 = arith.constant 0 : i32
    %c0_i32_1 = arith.constant 0 : i32
    return %c0_i32, %c0_i32_0 : i32, i32
  }
  func.func @transform_5(%arg0: i32, %arg1: i32) -> (i32, i32) {
    %c0_i32 = arith.constant 0 : i32
    %c0_i32_0 = arith.constant 0 : i32
    %c0_i32_1 = arith.constant 0 : i32
    return %c0_i32, %c0_i32_0 : i32, i32
  }
  func.func @transform_6(%arg0: i32, %arg1: i32) -> (i32, i32) {
    %c0_i32 = arith.constant 0 : i32
    %c0_i32_0 = arith.constant 0 : i32
    %c0_i32_1 = arith.constant 0 : i32
    return %c0_i32, %c0_i32_0 : i32, i32
  }
  func.func @transform_7(%arg0: i32, %arg1: i32) -> (i32, i32) {
    %c0_i32 = arith.constant 0 : i32
    %c0_i32_0 = arith.constant 0 : i32
    return %arg0, %c0_i32 : i32, i32
  }
}

</mosaic_0001>

<bundles_post_ra>
// kernel: tpu_custom_call.1
= control target key start
LH: loop header
LB: loop body
LE: loop exit
PB: predicated region body
PF: predicated region fallthrough
CT: control target
= control target key end

     0   :  { %12 = vsyncpa [#allocation4], 0  ;;  %s784_s0 = inlined_call_operand.hbm [shape: f32[16,128], index: 0, kind: input, shape index: {}]   ;;  %s785_s1 = inlined_call_operand.hbm [shape: bf16[128,256], index: 1, kind: input, shape index: {}]   ;;  %s786_s2 = inlined_call_operand.vmem [shape: f32[1,256], index: 2, kind: input, shape index: {}]   ;;  %s787_s3 = inlined_call_operand.hbm [shape: bf16[256,128], index: 3, kind: input, shape index: {}]   ;;  %s788_s4 = inlined_call_operand.vmem [shape: f32[1,128], index: 4, kind: input, shape index: {}]   ;;  %s789_s5 = inlined_call_operand.vmem [shape: f32[1,128], index: 5, kind: input, shape index: {}]   ;;  %s790_s6 = inlined_call_operand.vmem [shape: f32[1,128], index: 6, kind: input, shape index: {}]   ;;  %s791_s7 = inlined_call_operand.hbm [shape: f32[16,128], index: 7, kind: output, shape index: {}]  }
   0x1   :  { %13 = vsyncpa [#allocation7], 0 }
   0x2   :  { %14 = vsyncpa [#allocation5], 0  ;;  %s702_s24 = smov [#allocation6]   ;;  %s703_s26 = smov [#allocation3]  }
   0x3   :  { %s32_s25 = sshll.u32 %s702_s24, 4  ;;  %s20_s27 = sshll.u32 %s703_s26, 4  ;;  %s33_s25 = int_to_ptr.vmem [resolvable:$true] %s32_s25  ;;  %s21_s27 = int_to_ptr.vmem [resolvable:$true] %s20_s27 }
   0x4   :  { %s624_s28 = scalar_lea.vmem %s33_s25, 2048  ;;  %p629_p1 = scmp.lt.s32.totalorder %s33_s25, %s33_s25 }
   0x5   :  { %p625_p0 = scmp.ne.s32.totalorder %s33_s25, %s624_s28  ;;  %p630_p2 = scmp.lt.s32.totalorder %s624_s28, %s624_s28 }
   0x7   :  { %p631_p3 = por %p630_p2, %p629_p1 }
   0x9   :  { %p632_p4 = pnand %p631_p3, %p625_p0 }
   0xb   :  { %635 = shalt.err (!%p632_p4)
}
   0xc   :  { %s704_s29 = smov 128   ;;  %s705_s30 = smov 8  }
   0xd   :  { %38 = dma.hbm_to_vmem [thread:$0]  %s785_s1, 2048, %s33_s25, [#allocation7], %s704_s29, %s704_s29, %s705_s30  }
   0xe   :  { %s644_s10 = scalar_lea.vmem %s21_s27, 256  ;;  %p649_p6 = scmp.lt.s32.totalorder %s21_s27, %s21_s27 }
   0xf   :  { %p645_p5 = scmp.ne.s32.totalorder %s21_s27, %s644_s10  ;;  %p650_p7 = scmp.lt.s32.totalorder %s644_s10, %s644_s10 }
  0x11   :  { %p651_p8 = por %p650_p7, %p649_p6 }
  0x13   :  { %p652_p9 = pnand %p651_p8, %p645_p5 }
  0x15   :  { %655 = shalt.err (!%p652_p9)
}
  0x16   :  { %26 = dma.hbm_to_vmem [thread:$0]  %s784_s0, 256, %s21_s27, [#allocation4], %s704_s29, %s704_s29, %s705_s30  }
  0x17   :  { %s706_s13 = smov [#allocation8]  }
  0x18   :  { %s46_s14 = sshll.u32 %s706_s13, 4  ;;  %s47_s14 = int_to_ptr.vmem [resolvable:$true] %s46_s14 }
  0x19   :  { %s664_s15 = scalar_lea.vmem %s47_s14, 2048  ;;  %p669_p11 = scmp.lt.s32.totalorder %s47_s14, %s47_s14 }
  0x1a   :  { %p665_p10 = scmp.ne.s32.totalorder %s47_s14, %s664_s15  ;;  %p670_p12 = scmp.lt.s32.totalorder %s664_s15, %s664_s15 }
  0x1c   :  { %p671_p13 = por %p670_p12, %p669_p11 }
  0x1e   :  { %p672_p0 = pnand %p671_p13, %p665_p10 }
  0x20   :  { %675 = shalt.err (!%p672_p0)
}
  0x21   :  { %s707_s1 = smov 64   ;;  %s708_s16 = smov 4  }
  0x22   :  { %52 = dma.hbm_to_vmem [thread:$0]  %s787_s3, 2048, %s47_s14, [#allocation7], %s707_s1, %s707_s1, %s708_s16  }
  0x23   :  { %696 = dma.done.wait [#allocation4], 256  }
  0x24   :  { %697 = vsyncadd [#allocation4], 4294967040 }
  0x25   :  { %698 = dma.done.wait [#allocation7], 4096  }
  0x26   :  { %699 = vsyncadd [#allocation7], 4294963200  ;;  %v709_v0 = vmov 0   ;;  %v568_v1 = vld [vmem:[#allocation6 + $0x74] ss:$8 sps:$4 sm:$0xff]   ;;  %v596_v16 = vld [vmem:[#allocation8 + $0x68] sm:$0xff]   ;;  %v96_v36 = vlaneseq }
  0x27   :  { %218 = vmatprep.mubr.bf16.mxu0 %v709_v0  ;;  %v570_v2 = vld [vmem:[#allocation6 + $0x70] ss:$8 sps:$4 sm:$0xff]   ;;  %186 = vmatprep.subr.bf16.mxu0 %v568_v1  ;;  %v571_v3 = vld [vmem:[#allocation6 + $0x64] ss:$8 sps:$4 sm:$0xff]   ;;  %v573_v4 = vld [vmem:[#allocation6 + $0x60] ss:$8 sps:$4 sm:$0xff]  }
  0x28   :  { %187 = vmatpush1.bf16.msra.mxu0 %v570_v2  ;;  %v574_v5 = vld [vmem:[#allocation6 + $0x54] ss:$8 sps:$4 sm:$0xff]   ;;  %v576_v6 = vld [vmem:[#allocation6 + $0x50] ss:$8 sps:$4 sm:$0xff]   ;;  %v577_v7 = vld [vmem:[#allocation6 + $0x44] ss:$8 sps:$4 sm:$0xff]  }
  0x29   :  { %188 = vmatprep.subr.bf16.mxu0 %v571_v3  ;;  %v579_v8 = vld [vmem:[#allocation6 + $0x40] ss:$8 sps:$4 sm:$0xff]   ;;  %v580_v9 = vld [vmem:[#allocation6 + $0x34] ss:$8 sps:$4 sm:$0xff]   ;;  %v582_v11 = vld [vmem:[#allocation6 + $0x30] ss:$8 sps:$4 sm:$0xff]  }
  0x2a   :  { %v592_v10 = vld [vmem:[#allocation8 + $0x78] sm:$0xff]   ;;  %v583_v13 = vld [vmem:[#allocation6 + $0x24] ss:$8 sps:$4 sm:$0xff]   ;;  %v594_v14 = vld [vmem:[#allocation8 + $0x70] sm:$0xff]   ;;  %v97_v37 = vshrl.u32 %v96_v36, 7  ;;  %s710_s23 = smov [#allocation9]  }
  0x2b   :  { %v593_v12 = vld [vmem:[#allocation8 + $0x38] sm:$0xff]   ;;  %537 = vmatprep.subr.bf16.mxu1 %v592_v10  ;;  %v595_v15 = vld [vmem:[#allocation8 + $0x30] sm:$0xff]   ;;  %v585_v17 = vld [vmem:[#allocation6 + $0x20] ss:$8 sps:$4 sm:$0xff]   ;;  %s489_s24 = sshll.u32 %s710_s23, 4  ;;  %s490_s24 = int_to_ptr.vmem [resolvable:$true] %s489_s24 }
  0x2c   :  { %189 = vmatpush1.bf16.msra.mxu0 %v573_v4  ;;  %538 = vmatpush3.bf16.msra.mxu1 %v593_v12  ;;  %v586_v18 = vld [vmem:[#allocation6 + $0x14] ss:$8 sps:$4 sm:$0xff]   ;;  %v597_v19 = vld [vmem:[#allocation8 + $0x28] sm:$0xff]   ;;  %v598_v20 = vld [vmem:[#allocation8 + $0x60] sm:$0xff]   ;;  %v102_v38 = vsub.s32 1, %v97_v37  ;;  %v98_v39 = vsub.s32 0, %v97_v37  ;;  %p681_p2 = scmp.lt.s32.totalorder %s490_s24, %s490_s24 }
  0x2d   :  { %190 = vmatprep.subr.bf16.mxu0 %v574_v5  ;;  %539 = vmatprep.subr.bf16.mxu1 %v594_v14  ;;  %v588_v21 = vld [vmem:[#allocation6 + $0x10] ss:$8 sps:$4 sm:$0xff]   ;;  %v599_v22 = vld [vmem:[#allocation8 + $0x20] sm:$0xff]   ;;  %v604_v32 = vld [vmem:[#allocation8 + $0x48] sm:$0xff]   ;;  %s676_s25 = scalar_lea.vmem %s490_s24, 256 }
  0x2e   :  { %v589_v23 = vld [vmem:[#allocation6 + $0x4] ss:$8 sps:$4 sm:$0xff]   ;;  %v600_v24 = vld [vmem:[#allocation8 + $0x58] sm:$0xff]   ;;  %v591_v25 = vld [vmem:[#allocation6] ss:$8 sps:$4 sm:$0xff]   ;;  %p677_p1 = scmp.ne.s32.totalorder %s490_s24, %s676_s25  ;;  %p682_p3 = scmp.lt.s32.totalorder %s676_s25, %s676_s25 }
  0x2f   :  { %v75_v26 = vld [vmem:[#allocation3] sm:$0xff]  ;;  %v76_v27 = vld [vmem:[#allocation3 + $0x8] sm:$0xff]  ;;  %v605_v33 = vld [vmem:[#allocation8 + $0x8] sm:$0xff]  }
  0x30   :  { %191 = vmatpush1.bf16.msra.mxu0 %v576_v6  ;;  %540 = vmatpush3.bf16.msra.mxu1 %v595_v15  ;;  %v601_v28 = vld [vmem:[#allocation8 + $0x18] sm:$0xff]   ;;  %v77_v29 = vpack.c.bf16 %v76_v27, %v75_v26  ;;  %v602_v30 = vld [vmem:[#allocation8 + $0x50] sm:$0xff]   ;;  %v606_v34 = vld [vmem:[#allocation8 + $0x40] sm:$0xff]   ;;  %p683_p4 = por %p682_p3, %p681_p2 }
  0x31   :  { %192 = vmatprep.subr.bf16.mxu0 %v577_v7  ;;  %541 = vmatprep.subr.bf16.mxu1 %v596_v16  ;;  %v603_v31 = vld [vmem:[#allocation8 + $0x10] sm:$0xff]   ;;  %v607_v35 = vld [vmem:[#allocation8] sm:$0xff]  }
  0x32   :  { %v94_v40 = vld [vmem:[%s786_s2] sm:$0x3]  ;;  %p684_p5 = pnand %p683_p4, %p677_p1 }
  0x33   :  { %v103_v42 = vrot.slane %v94_v40, %v102_v38  ;;  %v99_v43 = vrot.slane %v94_v40, %v98_v39  ;;  %v534_v59 = vld [vmem:[%s788_s4] ss:$0 sm:$0xff] }
  0x34   :  { %193 = vmatpush1.bf16.msra.mxu0 %v579_v8  ;;  %542 = vmatpush3.bf16.msra.mxu1 %v597_v19  ;;  %v535_v27 = vld [vmem:[%s789_s5] ss:$0 sm:$0xff] }
  0x35   :  { %194 = vmatprep.subr.bf16.mxu0 %v580_v9  ;;  %543 = vmatprep.subr.bf16.mxu1 %v598_v20 }
  0x38   :  { %195 = vmatpush1.bf16.msra.mxu0 %v582_v11  ;;  %544 = vmatpush3.bf16.msra.mxu1 %v599_v22 }
  0x39   :  { %196 = vmatprep.subr.bf16.mxu0 %v583_v13  ;;  %545 = vmatprep.subr.bf16.mxu1 %v600_v24 }
  0x3c   :  { %197 = vmatpush1.bf16.msra.mxu0 %v585_v17  ;;  %546 = vmatpush3.bf16.msra.mxu1 %v601_v28 }
  0x3d   :  { %198 = vmatprep.subr.bf16.mxu0 %v586_v18  ;;  %547 = vmatprep.subr.bf16.mxu1 %v602_v30 }
  0x40   :  { %199 = vmatpush1.bf16.msra.mxu0 %v588_v21  ;;  %548 = vmatpush3.bf16.msra.mxu1 %v603_v31 }
  0x41   :  { %200 = vmatprep.subr.bf16.mxu0 %v589_v23  ;;  %549 = vmatprep.subr.bf16.mxu1 %v604_v32 }
  0x44   :  { %201 = vmatpush1.bf16.msra.mxu0 %v591_v25  ;;  %550 = vmatpush3.bf16.msra.mxu1 %v605_v33 }
  0x45   :  { %551 = vmatprep.subr.bf16.mxu1 %v606_v34 }
  0x47   :  { %219 = vmatmul.mubr.bf16.vlgmr.msra.gmra.mxu0 %v77_v29  ;;  %v536_v29 = vld [vmem:[%s790_s6] ss:$0 sm:$0xff] }
  0x48   :  { %552 = vmatpush3.bf16.msra.mxu1 %v607_v35 }
 0x107   :  { %v220_v41 = vpop.f32.mrf.mxu0 }
 0x108   :  { %v221_v48 = vadd.f32 %v220_v41, %v99_v43 }
 0x109   :  { %v222_v44 = vpop.f32.mrf.mxu0 }
 0x10a   :  { %v223_v46 = vadd.f32 %v222_v44, %v103_v42  ;;  %v229_v54 = vmax.f32 %v221_v48, 0.0 }
 0x10b   :  { %v224_v45 = vpop.f32.mrf.mxu0 }
 0x10c   :  { %v225_v47 = vadd.f32 %v224_v45, %v99_v43  ;;  %v230_v52 = vmax.f32 %v223_v46, 0.0 }
 0x10d   :  { %v226_v49 = vpop.f32.mrf.mxu0 }
 0x10e   :  { %v227_v50 = vadd.f32 %v226_v49, %v103_v42  ;;  %v231_v51 = vmax.f32 %v225_v47, 0.0 }
 0x110   :  { %v232_v53 = vmax.f32 %v227_v50, 0.0  ;;  %v235_v56 = vpack.c.bf16 %v231_v51, %v229_v54 }
 0x112   :  { %v236_v55 = vpack.c.bf16 %v232_v53, %v230_v52 }
 0x114   :  { %397 = vmatprep.mubr.bf16.mxu1 %v236_v55 }
 0x115   :  { %398 = vmatmul.mubr.bf16.vlgmr.msra.gmra.mxu1 %v235_v56 }
 0x1d5   :  { %v553_v57 = vpop.f32.mrf.mxu1 }
 0x1d7   :  { %v554_v58 = vpop.f32.mrf.mxu1 }
 0x1d8   :  { %v555_v60 = vadd.f32 %v554_v58, %v553_v57 }
 0x1d9   :  { %v556_v61 = vpop.f32.mrf.mxu1 }
 0x1da   :  { %v422_v62 = vadd.f32 %v555_v60, %v534_v59 }
 0x1db   :  { %v557_v63 = vpop.f32.mrf.mxu1 }
 0x1dc   :  { %v558_v0 = vadd.f32 %v557_v63, %v556_v61  ;;  %424 = vadd.xlane.f32.xlu0 %v422_v62 }
 0x1de   :  { %v423_v1 = vadd.f32 %v558_v0, %v534_v59 }
 0x1e0   :  { %426 = vadd.xlane.f32.xlu0 %v423_v1 }
 0x265   :  { %v425_v2 = vpop.xlane.xlu0 %424 }
 0x266   :  { %v429_v3 = vmul.f32 0.0078125, %v425_v2 }
 0x268   :  { %v431_v4 = vsub.f32 %v422_v62, %v429_v3 }
 0x269   :  { %v427_v5 = vpop.xlane.xlu0 %426 }
 0x26a   :  { %v430_v6 = vmul.f32 0.0078125, %v427_v5  ;;  %v433_v7 = vmul.f32 %v431_v4, %v431_v4 }
 0x26c   :  { %v432_v8 = vsub.f32 %v423_v1, %v430_v6  ;;  %435 = vadd.xlane.f32.xlu1 %v433_v7 }
 0x26e   :  { %v434_v9 = vmul.f32 %v432_v8, %v432_v8 }
 0x270   :  { %437 = vadd.xlane.f32.xlu1 %v434_v9 }
 0x2f5   :  { %v436_v10 = vpop.xlane.xlu1 %435 }
 0x2f6   :  { %v440_v11 = vmul.f32 0.007874016, %v436_v10 }
 0x2f8   :  { %608 = vrsqrt.f32 %v440_v11  ;;  %vm444_vm0 = vcmp.eq.f32.partialorder %v440_v11, inf  ;;  %v447_v16 = vand.u32 2147483648, %v440_v11  ;;  %vm446_vm1 = vcmp.eq.f32.partialorder %v440_v11, 0.0 }
 0x2f9   :  { %v438_v12 = vpop.xlane.xlu1 %437 }
 0x2fa   :  { %v441_v13 = vmul.f32 0.007874016, %v438_v12 }
 0x2fc   :  { %610 = vrsqrt.f32 %v441_v13  ;;  %vm451_vm2 = vcmp.eq.f32.partialorder %v441_v13, inf  ;;  %v454_v22 = vand.u32 2147483648, %v441_v13  ;;  %vm453_vm3 = vcmp.eq.f32.partialorder %v441_v13, 0.0 }
 0x305   :  { %v609_v14 = vpop.eup %608 }
 0x306   :  { %v443_v15 = vmul.f32 %v609_v14, %v440_v11 }
 0x308   :  { %v445_v17 = vsel %vm444_vm0, %v440_v11, %v443_v15 }
 0x309   :  { %v611_v18 = vpop.eup %610  ;;  %v448_v19 = vsel %vm446_vm1, %v447_v16, %v445_v17 }
 0x30a   :  { %v456_v20 = vadd.f32 1e-06, %v448_v19  ;;  %v450_v21 = vmul.f32 %v611_v18, %v441_v13 }
 0x30c   :  { %612 = vrcp.f32 %v456_v20  ;;  %v452_v23 = vsel %vm451_vm2, %v441_v13, %v450_v21 }
 0x30d   :  { %v455_v24 = vsel %vm453_vm3, %v454_v22, %v452_v23 }
 0x30e   :  { %v457_v25 = vadd.f32 1e-06, %v455_v24 }
 0x310   :  { %614 = vrcp.f32 %v457_v25 }
 0x319   :  { %v613_v26 = vpop.eup %612 }
 0x31a   :  { %v462_v28 = vmul.f32 %v613_v26, %v431_v4 }
 0x31c   :  { %v471_v30 = vmul.f32 %v535_v27, %v462_v28 }
 0x31d   :  { %v615_v31 = vpop.eup %614 }
 0x31e   :  { %v463_v32 = vmul.f32 %v615_v31, %v432_v8  ;;  %v480_v33 = vadd.f32 %v536_v29, %v471_v30 }
 0x320   :  { %v472_v34 = vmul.f32 %v535_v27, %v463_v32  ;;  %482 = vst [vmem:[#allocation9] sm:$0xff] %v480_v33 }
 0x322   :  { %v481_v35 = vadd.f32 %v536_v29, %v472_v34 }
 0x324   :  { %483 = vst [vmem:[#allocation9 + $0x8] sm:$0xff] %v481_v35 }
 0x325   :  { %687 = shalt.err (!%p684_p5)
}
 0x326   :  { %495 = dma.vmem_to_hbm [thread:$0]  %s490_s24, 256, %s791_s7, [#allocation5], %s704_s29, %s704_s29, %s705_s30  }
 0x327   :  { %700 = dma.done.wait [#allocation5], 256  }
 0x328   :  { %701 = vsyncadd [#allocation5], 4294967040 }
 0x329   :  { %499 = vsyncpa [#allocation4], 1 }
 0x32a   :  { %500 = vsyncpa [#allocation7], 1 }
 0x32b   :  { %501 = vsyncpa [#allocation5], 1 }

</bundles_post_ra>
